<compile_context>
chip_gen: v7x
topology: tpu7x:2x2x1
jax: 0.10.0
libtpu: 0.0.40
codegen_flags: <defaults>
</compile_context>

<pallas_src>
import math

import jax
import jax.numpy as jnp
from jax import lax
from jax.experimental import pallas as pl
from jax.experimental.pallas import tpu as pltpu


def _make_kernel(B, HW, E, Opad, H, scale):
    def kernel(x_ref, pos_sp_ref, pos_m_ref, avg_ref, hm_ref,
               wq_ref, bq_ref, wkv_ref, bkv_ref, wc_ref, bc_ref,
               o_ref, ctx_ref):
        f32 = jnp.float32

        # ---- spatial tokens: x + positional embedding (aligned rows) ----
        x_f = x_ref[...].astype(f32)                                   # (B*HW, E)
        tok_sp = (x_f + pos_sp_ref[...]).astype(jnp.bfloat16)          # (B*HW, E) bf16

        # ---- mean token per batch element (averaging matmul) + pos[0] ----
        mean = jnp.dot(avg_ref[...], x_f, preferred_element_type=f32)  # (B, E) f32
        mt = (mean + pos_m_ref[...]).astype(jnp.bfloat16)              # (B, E) bf16

        # ---- projections: batched q (M = B) and fused K/V (M = B*HW) ----
        q = (jnp.dot(mt, wq_ref[...], preferred_element_type=f32)
             + bq_ref[...]) * scale                                    # (B, E) f32
        kv_sp = (jnp.dot(tok_sp, wkv_ref[...], preferred_element_type=f32)
                 + bkv_ref[...])                                       # (B*HW, 2E) f32
        kv_m = (jnp.dot(mt, wkv_ref[...], preferred_element_type=f32)
                + bkv_ref[...])                                        # (B, 2E) f32
        k_sp, v_sp = kv_sp[:, 0:E], kv_sp[:, E:2 * E]
        k_m, v_m = kv_m[:, 0:E], kv_m[:, E:2 * E]

        head_mask = hm_ref[...]                                        # (H, E) f32

        # ---- attention (only the mean-token query is returned by the module).
        # Per-batch static unroll (B is small); head-mask trick keeps all ops
        # 2D which is fine at small E.
        # TODO(synk): for large E / many heads switch to per-head Dh-column
        # slices to avoid the H-fold redundant MXU work of the mask trick.
        for b in range(B):
            qh = q[b:b + 1, :] * head_mask                             # (H, E)
            k_b = k_sp[b * HW:(b + 1) * HW, :]                         # (HW, E)
            v_b = v_sp[b * HW:(b + 1) * HW, :]
            km = k_m[b:b + 1, :]                                       # (1, E)
            vm = v_m[b:b + 1, :]
            s_sp = lax.dot_general(qh, k_b, (((1,), (1,)), ((), ())),
                                   preferred_element_type=f32)         # (H, HW)
            s_m = jnp.sum(qh * km, axis=1, keepdims=True)              # (H, 1)
            m = jnp.maximum(jnp.max(s_sp, axis=-1, keepdims=True), s_m)
            p_sp = jnp.exp(s_sp - m)                                   # (H, HW)
            p_m = jnp.exp(s_m - m)                                     # (H, 1)
            inv = pl.reciprocal(jnp.sum(p_sp, axis=-1, keepdims=True) + p_m,
                                approx=True)                           # (H, 1)
            av = (jnp.dot(p_sp, v_b, preferred_element_type=f32)
                  + p_m * vm) * inv                                    # (H, E)
            ctx_ref[b:b + 1, :] = jnp.sum(av * head_mask, axis=0,
                                          keepdims=True)               # (1, E)

        # ---- c_proj for the whole batch tile (M = B, lane-dense output) ----
        out = (jnp.dot(ctx_ref[...].astype(jnp.bfloat16), wc_ref[...],
                       preferred_element_type=f32) + bc_ref[...])      # (B, Opad)
        o_ref[...] = out.astype(o_ref.dtype)

    return kernel


def attention_pool2d(x, params, num_heads):
    """x: (N, C, H, W) float32 NCHW. Returns (N, output_dim) float32."""
    N, C, Hs, Ws = x.shape
    HW = Hs * Ws
    E = C
    H = num_heads
    assert E % H == 0, "embed_dim must be divisible by num_heads"
    Dh = E // H
    O = params["wc"].shape[0]
    Opad = ((O + 127) // 128) * 128            # lane-dense output slab

    # Batch tile: amortize per-grid-step overhead and widen matmul M dims.
    B = min(8, N)
    n_tiles = (N + B - 1) // B
    if n_tiles > 1 and (B * HW) % 16 != 0:
        # keep the (B*HW, E) x-block bf16 sublane aligned; fall back to 1 tile
        B, n_tiles = N, 1
    N_pad = n_tiles * B

    # ---- host-side layout glue ----
    x_tok = jnp.transpose(x.reshape(N, C, HW), (0, 2, 1)).astype(jnp.float32)
    if N_pad != N:
        x_tok = jnp.pad(x_tok, ((0, N_pad - N), (0, 0), (0, 0)))
    x2d = x_tok.reshape(N_pad * HW, E).astype(jnp.bfloat16)       # (N_pad*HW, E)

    pos = params["pos"].astype(jnp.float32)                       # (HW+1, E)
    pos_sp = jnp.tile(pos[1:], (B, 1))                            # (B*HW, E)
    pos_m = pos[0:1]                                              # (1, E)

    # per-batch averaging matrix (mean over each element's HW spatial rows)
    avg = jnp.where(
        jnp.arange(B)[:, None] == (jnp.arange(B * HW)[None, :] // HW),
        1.0 / HW, 0.0).astype(jnp.float32)                        # (B, B*HW)
    # head mask, hoisted out of the kernel
    hm = jnp.where(
        jnp.arange(H)[:, None] == (jnp.arange(E)[None, :] // Dh),
        1.0, 0.0).astype(jnp.float32)                             # (H, E)

    wq_t = params["wq"].T.astype(jnp.bfloat16)                    # (E, E)
    wkv = jnp.concatenate([params["wk"].T, params["wv"].T],
                          axis=1).astype(jnp.bfloat16)            # (E, 2E)
    bq = params["bq"].reshape(1, E).astype(jnp.float32)
    bkv = jnp.concatenate([params["bk"], params["bv"]]
                          ).reshape(1, 2 * E).astype(jnp.float32)
    wc_t = jnp.pad(params["wc"].T,
                   ((0, 0), (0, Opad - O))).astype(jnp.bfloat16)  # (E, Opad)
    bc = jnp.pad(params["bc"], (0, Opad - O)
                 ).reshape(1, Opad).astype(jnp.float32)

    scale = Dh ** -0.5
    R = B * HW
    kernel = _make_kernel(B, HW, E, Opad, H, scale)

    grid_spec = pltpu.PrefetchScalarGridSpec(
        num_scalar_prefetch=0,
        grid=(n_tiles,),
        in_specs=[
            pl.BlockSpec((R, E), lambda g: (g, 0)),       # x rows of this tile
            pl.BlockSpec((R, E), lambda g: (0, 0)),       # tiled spatial pos
            pl.BlockSpec((1, E), lambda g: (0, 0)),       # pos[0] (mean token)
            pl.BlockSpec((B, R), lambda g: (0, 0)),       # averaging matrix
            pl.BlockSpec((H, E), lambda g: (0, 0)),       # head mask
            pl.BlockSpec((E, E), lambda g: (0, 0)),       # Wq^T
            pl.BlockSpec((1, E), lambda g: (0, 0)),       # bq
            pl.BlockSpec((E, 2 * E), lambda g: (0, 0)),   # [Wk^T | Wv^T]
            pl.BlockSpec((1, 2 * E), lambda g: (0, 0)),   # [bk | bv]
            pl.BlockSpec((E, Opad), lambda g: (0, 0)),    # Wc^T (lane padded)
            pl.BlockSpec((1, Opad), lambda g: (0, 0)),    # bc (lane padded)
        ],
        out_specs=pl.BlockSpec((B, Opad), lambda g: (g, 0)),
        scratch_shapes=[pltpu.VMEM((B, E), jnp.float32)],  # per-tile context
    )

    L = HW + 1
    flops = N_pad * (2 * HW * E * 2 * E       # spatial K/V projection
                     + 2 * E * 3 * E          # mean-token K/V + Q projection
                     + 4 * H * L * E          # scores + attn@V
                     + 2 * E * Opad)          # c_proj
    weight_bytes = 2 * (E * E + E * 2 * E + E * Opad) + 4 * (E + 2 * E + Opad)
    bytes_accessed = 2 * N_pad * HW * E + weight_bytes + 4 * N_pad * Opad
    cost = pl.CostEstimate(flops=int(flops),
                           transcendentals=int(N_pad * H * L),
                           bytes_accessed=int(bytes_accessed))

    out = pl.pallas_call(
        kernel,
        out_shape=jax.ShapeDtypeStruct((N_pad, Opad), jnp.float32),
        grid_spec=grid_spec,
        compiler_params=pltpu.CompilerParams(
            dimension_semantics=("parallel",),
            vmem_limit_bytes=64 * 1024 * 1024),
        cost_estimate=cost,
    )(x2d, pos_sp, pos_m, avg, hm, wq_t, bq, wkv, bkv, wc_t, bc)
    return out[:N, :O]


def ref_forward(x, params, num_heads):
    """Pure-JAX f32 reference mirroring the PyTorch module exactly."""
    N, C, Hs, Ws = x.shape
    HW = Hs * Ws
    E = C
    H = num_heads
    Dh = E // H
    xs = jnp.transpose(x.reshape(N, C, HW), (2, 0, 1))               # (HW, N, E)
    xs = jnp.concatenate([xs.mean(axis=0, keepdims=True), xs], 0)    # (L, N, E)
    xs = xs + params["pos"][:, None, :]
    L = xs.shape[0]
    q = (xs @ params["wq"].T + params["bq"]) * (Dh ** -0.5)
    k = xs @ params["wk"].T + params["bk"]
    v = xs @ params["wv"].T + params["bv"]
    qh = q.reshape(L, N, H, Dh)
    kh = k.reshape(L, N, H, Dh)
    vh = v.reshape(L, N, H, Dh)
    scores = jnp.einsum("qnhd,knhd->nhqk", qh, kh)
    attn = jax.nn.softmax(scores, axis=-1)
    ctx = jnp.einsum("nhqk,knhd->qnhd", attn, vh).reshape(L, N, E)
    out = ctx @ params["wc"].T + params["bc"]
    return out[0]


if __name__ == "__main__":
    # Module config (small, consistent with AttentionPool2d.__init__)
    spacial_dim = 4
    embed_dim = 32
    num_heads = 4
    output_dim = 16
    N = 2

    HW = spacial_dim * spacial_dim
    L = HW + 1
    E = embed_dim
    O = output_dim

    key = jax.random.PRNGKey(0)
    ks = jax.random.split(key, 10)
    params = {
        "pos": jax.random.normal(ks[0], (L, E), jnp.float32) / math.sqrt(E),
        "wq": jax.random.normal(ks[1], (E, E), jnp.float32) * 0.1,
        "bq": jax.random.normal(ks[2], (E,), jnp.float32) * 0.1,
        "wk": jax.random.normal(ks[3], (E, E), jnp.float32) * 0.1,
        "bk": jax.random.normal(ks[4], (E,), jnp.float32) * 0.1,
        "wv": jax.random.normal(ks[5], (E, E), jnp.float32) * 0.1,
        "bv": jax.random.normal(ks[6], (E,), jnp.float32) * 0.1,
        "wc": jax.random.normal(ks[7], (O, E), jnp.float32) * 0.1,
        "bc": jax.random.normal(ks[8], (O,), jnp.float32) * 0.1,
    }
    x = jax.random.normal(ks[9], (N, E, spacial_dim, spacial_dim), jnp.float32)

    out = attention_pool2d(x, params, num_heads)
    out = jax.block_until_ready(out)

    ref = ref_forward(x, params, num_heads)
    assert out.shape == (N, O), (out.shape, (N, O))
    max_err = float(jnp.max(jnp.abs(out - ref)))
    # bf16 MXU operands (per perf review) -> relaxed tolerance vs f32 reference
    assert jnp.allclose(out, ref, atol=5e-2, rtol=5e-2), max_err

    print("KERNEL_OK")
</pallas_src>

<mosaic_0001>
module attributes {stable_mosaic.version = 11 : i64} {
  func.func @kernel(%arg0: i32, %arg1: memref<32x32xbf16, #tpu.memory_space<vmem>>, %arg2: memref<32x32xf32, #tpu.memory_space<vmem>>, %arg3: memref<1x32xf32, #tpu.memory_space<vmem>>, %arg4: memref<2x32xf32, #tpu.memory_space<vmem>>, %arg5: memref<4x32xf32, #tpu.memory_space<vmem>>, %arg6: memref<32x32xbf16, #tpu.memory_space<vmem>>, %arg7: memref<1x32xf32, #tpu.memory_space<vmem>>, %arg8: memref<32x64xbf16, #tpu.memory_space<vmem>>, %arg9: memref<1x64xf32, #tpu.memory_space<vmem>>, %arg10: memref<32x128xbf16, #tpu.memory_space<vmem>>, %arg11: memref<1x128xf32, #tpu.memory_space<vmem>>, %arg12: memref<2x128xf32, #tpu.memory_space<vmem>>, %arg13: memref<2x32xf32, #tpu.memory_space<vmem>>) attributes {dimension_semantics = [#tpu.dimension_semantics<parallel>], iteration_bounds = array<i64: 1>, scalar_prefetch = 0 : i64, scratch_operands = 1 : i64, tpu.core_type = #tpu.core_type<tc>, window_params = [{transform_indices = @transform_0, window_bounds = array<i64: 32, 32>}, {pipeline_mode = #tpu.pipeline_mode<synchronous>, transform_indices = @transform_1, window_bounds = array<i64: 32, 32>}, {pipeline_mode = #tpu.pipeline_mode<synchronous>, transform_indices = @transform_2, window_bounds = array<i64: 1, 32>}, {pipeline_mode = #tpu.pipeline_mode<synchronous>, transform_indices = @transform_3, window_bounds = array<i64: 2, 32>}, {pipeline_mode = #tpu.pipeline_mode<synchronous>, transform_indices = @transform_4, window_bounds = array<i64: 4, 32>}, {pipeline_mode = #tpu.pipeline_mode<synchronous>, transform_indices = @transform_5, window_bounds = array<i64: 32, 32>}, {pipeline_mode = #tpu.pipeline_mode<synchronous>, transform_indices = @transform_6, window_bounds = array<i64: 1, 32>}, {pipeline_mode = #tpu.pipeline_mode<synchronous>, transform_indices = @transform_7, window_bounds = array<i64: 32, 64>}, {pipeline_mode = #tpu.pipeline_mode<synchronous>, transform_indices = @transform_8, window_bounds = array<i64: 1, 64>}, {pipeline_mode = #tpu.pipeline_mode<synchronous>, transform_indices = @transform_9, window_bounds = array<i64: 32, 128>}, {pipeline_mode = #tpu.pipeline_mode<synchronous>, transform_indices = @transform_10, window_bounds = array<i64: 1, 128>}, {transform_indices = @transform_11, window_bounds = array<i64: 2, 128>}]} {
    %c0 = arith.constant 0 : index
    %c0_0 = arith.constant 0 : index
    %0 = vector.load %arg1[%c0, %c0_0] : memref<32x32xbf16, #tpu.memory_space<vmem>>, vector<32x32xbf16>
    %1 = arith.extf %0 : vector<32x32xbf16> to vector<32x32xf32>
    %c0_1 = arith.constant 0 : index
    %c0_2 = arith.constant 0 : index
    %2 = vector.load %arg2[%c0_1, %c0_2] : memref<32x32xf32, #tpu.memory_space<vmem>>, vector<32x32xf32>
    %3 = arith.addf %1, %2 : vector<32x32xf32>
    %4 = arith.truncf %3 : vector<32x32xf32> to vector<32x32xbf16>
    %c0_3 = arith.constant 0 : index
    %c0_4 = arith.constant 0 : index
    %5 = vector.load %arg4[%c0_3, %c0_4] : memref<2x32xf32, #tpu.memory_space<vmem>>, vector<2x32xf32>
    %cst = arith.constant dense<0.000000e+00> : vector<2x32xf32>
    %6 = tpu.matmul %5, %1, %cst {dimension_numbers = #tpu.dot_dimension_numbers<[1], [0], [0], [1], [0, 0, 1, 1], [], []>} : vector<2x32xf32>, vector<32x32xf32>, vector<2x32xf32> -> vector<2x32xf32>
    %c0_5 = arith.constant 0 : index
    %c0_6 = arith.constant 0 : index
    %7 = vector.load %arg3[%c0_5, %c0_6] : memref<1x32xf32, #tpu.memory_space<vmem>>, vector<1x32xf32>
    %8 = vector.broadcast %7 : vector<1x32xf32> to vector<2x32xf32>
    %9 = arith.addf %6, %8 : vector<2x32xf32>
    %10 = arith.truncf %9 : vector<2x32xf32> to vector<2x32xbf16>
    %c0_7 = arith.constant 0 : index
    %c0_8 = arith.constant 0 : index
    %11 = vector.load %arg6[%c0_7, %c0_8] : memref<32x32xbf16, #tpu.memory_space<vmem>>, vector<32x32xbf16>
    %cst_9 = arith.constant dense<0.000000e+00> : vector<2x32xf32>
    %12 = tpu.matmul %10, %11, %cst_9 {dimension_numbers = #tpu.dot_dimension_numbers<[1], [0], [0], [1], [0, 0, 1, 1], [], []>} : vector<2x32xbf16>, vector<32x32xbf16>, vector<2x32xf32> -> vector<2x32xf32>
    %c0_10 = arith.constant 0 : index
    %c0_11 = arith.constant 0 : index
    %13 = vector.load %arg7[%c0_10, %c0_11] : memref<1x32xf32, #tpu.memory_space<vmem>>, vector<1x32xf32>
    %14 = vector.broadcast %13 : vector<1x32xf32> to vector<2x32xf32>
    %15 = arith.addf %12, %14 : vector<2x32xf32>
    %cst_12 = arith.constant 0.353553385 : f32
    %16 = vector.broadcast %cst_12 : f32 to vector<2x32xf32>
    %17 = arith.mulf %15, %16 : vector<2x32xf32>
    %c0_13 = arith.constant 0 : index
    %c0_14 = arith.constant 0 : index
    %18 = vector.load %arg8[%c0_13, %c0_14] : memref<32x64xbf16, #tpu.memory_space<vmem>>, vector<32x64xbf16>
    %cst_15 = arith.constant dense<0.000000e+00> : vector<32x64xf32>
    %19 = tpu.matmul %4, %18, %cst_15 {dimension_numbers = #tpu.dot_dimension_numbers<[1], [0], [0], [1], [0, 0, 1, 1], [], []>} : vector<32x32xbf16>, vector<32x64xbf16>, vector<32x64xf32> -> vector<32x64xf32>
    %c0_16 = arith.constant 0 : index
    %c0_17 = arith.constant 0 : index
    %20 = vector.load %arg9[%c0_16, %c0_17] : memref<1x64xf32, #tpu.memory_space<vmem>>, vector<1x64xf32>
    %21 = vector.broadcast %20 : vector<1x64xf32> to vector<32x64xf32>
    %22 = arith.addf %19, %21 : vector<32x64xf32>
    %c0_18 = arith.constant 0 : index
    %c0_19 = arith.constant 0 : index
    %23 = vector.load %arg8[%c0_18, %c0_19] : memref<32x64xbf16, #tpu.memory_space<vmem>>, vector<32x64xbf16>
    %cst_20 = arith.constant dense<0.000000e+00> : vector<2x64xf32>
    %24 = tpu.matmul %10, %23, %cst_20 {dimension_numbers = #tpu.dot_dimension_numbers<[1], [0], [0], [1], [0, 0, 1, 1], [], []>} : vector<2x32xbf16>, vector<32x64xbf16>, vector<2x64xf32> -> vector<2x64xf32>
    %c0_21 = arith.constant 0 : index
    %c0_22 = arith.constant 0 : index
    %25 = vector.load %arg9[%c0_21, %c0_22] : memref<1x64xf32, #tpu.memory_space<vmem>>, vector<1x64xf32>
    %26 = vector.broadcast %25 : vector<1x64xf32> to vector<2x64xf32>
    %27 = arith.addf %24, %26 : vector<2x64xf32>
    %28 = vector.extract_strided_slice %22 {offsets = [0, 0], sizes = [32, 32], strides = [1, 1]} : vector<32x64xf32> to vector<32x32xf32>
    %29 = vector.extract_strided_slice %22 {offsets = [0, 32], sizes = [32, 32], strides = [1, 1]} : vector<32x64xf32> to vector<32x32xf32>
    %30 = vector.extract_strided_slice %27 {offsets = [0, 0], sizes = [2, 32], strides = [1, 1]} : vector<2x64xf32> to vector<2x32xf32>
    %31 = vector.extract_strided_slice %27 {offsets = [0, 32], sizes = [2, 32], strides = [1, 1]} : vector<2x64xf32> to vector<2x32xf32>
    %c0_23 = arith.constant 0 : index
    %c0_24 = arith.constant 0 : index
    %32 = vector.load %arg5[%c0_23, %c0_24] : memref<4x32xf32, #tpu.memory_space<vmem>>, vector<4x32xf32>
    %33 = vector.extract_strided_slice %17 {offsets = [0, 0], sizes = [1, 32], strides = [1, 1]} : vector<2x32xf32> to vector<1x32xf32>
    %34 = vector.broadcast %33 : vector<1x32xf32> to vector<4x32xf32>
    %35 = arith.mulf %34, %32 : vector<4x32xf32>
    %36 = vector.extract_strided_slice %28 {offsets = [0, 0], sizes = [16, 32], strides = [1, 1]} : vector<32x32xf32> to vector<16x32xf32>
    %37 = vector.extract_strided_slice %29 {offsets = [0, 0], sizes = [16, 32], strides = [1, 1]} : vector<32x32xf32> to vector<16x32xf32>
    %38 = vector.extract_strided_slice %30 {offsets = [0, 0], sizes = [1, 32], strides = [1, 1]} : vector<2x32xf32> to vector<1x32xf32>
    %39 = vector.extract_strided_slice %31 {offsets = [0, 0], sizes = [1, 32], strides = [1, 1]} : vector<2x32xf32> to vector<1x32xf32>
    %cst_25 = arith.constant dense<0.000000e+00> : vector<4x16xf32>
    %40 = tpu.matmul %35, %36, %cst_25 {dimension_numbers = #tpu.dot_dimension_numbers<[1], [1], [0], [0], [0, 0, 1, 0], [], []>} : vector<4x32xf32>, vector<16x32xf32>, vector<4x16xf32> -> vector<4x16xf32>
    %41 = vector.broadcast %38 : vector<1x32xf32> to vector<4x32xf32>
    %42 = arith.mulf %35, %41 : vector<4x32xf32>
    %cst_26 = arith.constant dense<0.000000e+00> : vector<4xf32>
    %43 = vector.multi_reduction <add>, %42, %cst_26 [1] : vector<4x32xf32> to vector<4xf32>
    %44 = vector.shape_cast %43 : vector<4xf32> to vector<4x1xf32>
    %cst_27 = arith.constant dense<0xFF800000> : vector<4xf32>
    %45 = vector.multi_reduction <maximumf>, %40, %cst_27 [1] : vector<4x16xf32> to vector<4xf32>
    %46 = vector.shape_cast %45 : vector<4xf32> to vector<4x1xf32>
    %47 = arith.maximumf %46, %44 : vector<4x1xf32>
    %48 = vector.broadcast %47 : vector<4x1xf32> to vector<4x16xf32>
    %49 = arith.subf %40, %48 : vector<4x16xf32>
    %50 = math.exp %49 : vector<4x16xf32>
    %51 = arith.subf %44, %47 : vector<4x1xf32>
    %52 = math.exp %51 : vector<4x1xf32>
    %cst_28 = arith.constant dense<0.000000e+00> : vector<4xf32>
    %53 = vector.multi_reduction <add>, %50, %cst_28 [1] : vector<4x16xf32> to vector<4xf32>
    %54 = vector.shape_cast %53 : vector<4xf32> to vector<4x1xf32>
    %55 = arith.addf %54, %52 : vector<4x1xf32>
    %56 = tpu.reciprocal %55 {approx = true} : vector<4x1xf32> -> vector<4x1xf32>
    %cst_29 = arith.constant dense<0.000000e+00> : vector<4x32xf32>
    %57 = tpu.matmul %50, %37, %cst_29 {dimension_numbers = #tpu.dot_dimension_numbers<[1], [0], [0], [1], [0, 0, 1, 1], [], []>} : vector<4x16xf32>, vector<16x32xf32>, vector<4x32xf32> -> vector<4x32xf32>
    %58 = vector.broadcast %52 : vector<4x1xf32> to vector<4x32xf32>
    %59 = vector.broadcast %39 : vector<1x32xf32> to vector<4x32xf32>
    %60 = arith.mulf %58, %59 : vector<4x32xf32>
    %61 = arith.addf %57, %60 : vector<4x32xf32>
    %62 = vector.broadcast %56 : vector<4x1xf32> to vector<4x32xf32>
    %63 = arith.mulf %61, %62 : vector<4x32xf32>
    %64 = arith.mulf %63, %32 : vector<4x32xf32>
    %cst_30 = arith.constant dense<0.000000e+00> : vector<32xf32>
    %65 = vector.multi_reduction <add>, %64, %cst_30 [0] : vector<4x32xf32> to vector<32xf32>
    %66 = vector.shape_cast %65 : vector<32xf32> to vector<1x32xf32>
    %c0_31 = arith.constant 0 : index
    %c0_32 = arith.constant 0 : index
    %67 = vector.load %arg13[%c0_31, %c0_32] : memref<2x32xf32, #tpu.memory_space<vmem>>, vector<1x32xf32>
    tpu.vector_store %arg13[%c0_31, %c0_32], %66 {strides = array<i32>} : memref<2x32xf32, #tpu.memory_space<vmem>>, vector<1x32xf32>,
    %68 = vector.extract_strided_slice %17 {offsets = [1, 0], sizes = [1, 32], strides = [1, 1]} : vector<2x32xf32> to vector<1x32xf32>
    %69 = vector.broadcast %68 : vector<1x32xf32> to vector<4x32xf32>
    %70 = arith.mulf %69, %32 : vector<4x32xf32>
    %71 = vector.extract_strided_slice %28 {offsets = [16, 0], sizes = [16, 32], strides = [1, 1]} : vector<32x32xf32> to vector<16x32xf32>
    %72 = vector.extract_strided_slice %29 {offsets = [16, 0], sizes = [16, 32], strides = [1, 1]} : vector<32x32xf32> to vector<16x32xf32>
    %73 = vector.extract_strided_slice %30 {offsets = [1, 0], sizes = [1, 32], strides = [1, 1]} : vector<2x32xf32> to vector<1x32xf32>
    %74 = vector.extract_strided_slice %31 {offsets = [1, 0], sizes = [1, 32], strides = [1, 1]} : vector<2x32xf32> to vector<1x32xf32>
    %cst_33 = arith.constant dense<0.000000e+00> : vector<4x16xf32>
    %75 = tpu.matmul %70, %71, %cst_33 {dimension_numbers = #tpu.dot_dimension_numbers<[1], [1], [0], [0], [0, 0, 1, 0], [], []>} : vector<4x32xf32>, vector<16x32xf32>, vector<4x16xf32> -> vector<4x16xf32>
    %76 = vector.broadcast %73 : vector<1x32xf32> to vector<4x32xf32>
    %77 = arith.mulf %70, %76 : vector<4x32xf32>
    %cst_34 = arith.constant dense<0.000000e+00> : vector<4xf32>
    %78 = vector.multi_reduction <add>, %77, %cst_34 [1] : vector<4x32xf32> to vector<4xf32>
    %79 = vector.shape_cast %78 : vector<4xf32> to vector<4x1xf32>
    %cst_35 = arith.constant dense<0xFF800000> : vector<4xf32>
    %80 = vector.multi_reduction <maximumf>, %75, %cst_35 [1] : vector<4x16xf32> to vector<4xf32>
    %81 = vector.shape_cast %80 : vector<4xf32> to vector<4x1xf32>
    %82 = arith.maximumf %81, %79 : vector<4x1xf32>
    %83 = vector.broadcast %82 : vector<4x1xf32> to vector<4x16xf32>
    %84 = arith.subf %75, %83 : vector<4x16xf32>
    %85 = math.exp %84 : vector<4x16xf32>
    %86 = arith.subf %79, %82 : vector<4x1xf32>
    %87 = math.exp %86 : vector<4x1xf32>
    %cst_36 = arith.constant dense<0.000000e+00> : vector<4xf32>
    %88 = vector.multi_reduction <add>, %85, %cst_36 [1] : vector<4x16xf32> to vector<4xf32>
    %89 = vector.shape_cast %88 : vector<4xf32> to vector<4x1xf32>
    %90 = arith.addf %89, %87 : vector<4x1xf32>
    %91 = tpu.reciprocal %90 {approx = true} : vector<4x1xf32> -> vector<4x1xf32>
    %cst_37 = arith.constant dense<0.000000e+00> : vector<4x32xf32>
    %92 = tpu.matmul %85, %72, %cst_37 {dimension_numbers = #tpu.dot_dimension_numbers<[1], [0], [0], [1], [0, 0, 1, 1], [], []>} : vector<4x16xf32>, vector<16x32xf32>, vector<4x32xf32> -> vector<4x32xf32>
    %93 = vector.broadcast %87 : vector<4x1xf32> to vector<4x32xf32>
    %94 = vector.broadcast %74 : vector<1x32xf32> to vector<4x32xf32>
    %95 = arith.mulf %93, %94 : vector<4x32xf32>
    %96 = arith.addf %92, %95 : vector<4x32xf32>
    %97 = vector.broadcast %91 : vector<4x1xf32> to vector<4x32xf32>
    %98 = arith.mulf %96, %97 : vector<4x32xf32>
    %99 = arith.mulf %98, %32 : vector<4x32xf32>
    %cst_38 = arith.constant dense<0.000000e+00> : vector<32xf32>
    %100 = vector.multi_reduction <add>, %99, %cst_38 [0] : vector<4x32xf32> to vector<32xf32>
    %101 = vector.shape_cast %100 : vector<32xf32> to vector<1x32xf32>
    %c1 = arith.constant 1 : index
    %c0_39 = arith.constant 0 : index
    %102 = vector.load %arg13[%c1, %c0_39] : memref<2x32xf32, #tpu.memory_space<vmem>>, vector<1x32xf32>
    tpu.vector_store %arg13[%c1, %c0_39], %101 {strides = array<i32>} : memref<2x32xf32, #tpu.memory_space<vmem>>, vector<1x32xf32>,
    %c0_40 = arith.constant 0 : index
    %c0_41 = arith.constant 0 : index
    %103 = vector.load %arg13[%c0_40, %c0_41] : memref<2x32xf32, #tpu.memory_space<vmem>>, vector<2x32xf32>
    %104 = arith.truncf %103 : vector<2x32xf32> to vector<2x32xbf16>
    %c0_42 = arith.constant 0 : index
    %c0_43 = arith.constant 0 : index
    %105 = vector.load %arg10[%c0_42, %c0_43] : memref<32x128xbf16, #tpu.memory_space<vmem>>, vector<32x128xbf16>
    %cst_44 = arith.constant dense<0.000000e+00> : vector<2x128xf32>
    %106 = tpu.matmul %104, %105, %cst_44 {dimension_numbers = #tpu.dot_dimension_numbers<[1], [0], [0], [1], [0, 0, 1, 1], [], []>} : vector<2x32xbf16>, vector<32x128xbf16>, vector<2x128xf32> -> vector<2x128xf32>
    %c0_45 = arith.constant 0 : index
    %c0_46 = arith.constant 0 : index
    %107 = vector.load %arg11[%c0_45, %c0_46] : memref<1x128xf32, #tpu.memory_space<vmem>>, vector<1x128xf32>
    %108 = vector.broadcast %107 : vector<1x128xf32> to vector<2x128xf32>
    %109 = arith.addf %106, %108 : vector<2x128xf32>
    %c0_47 = arith.constant 0 : index
    %c0_48 = arith.constant 0 : index
    %110 = vector.load %arg12[%c0_47, %c0_48] : memref<2x128xf32, #tpu.memory_space<vmem>>, vector<2x128xf32>
    tpu.vector_store %arg12[%c0_47, %c0_48], %109 {strides = array<i32>} : memref<2x128xf32, #tpu.memory_space<vmem>>, vector<2x128xf32>,
    return
  }
  func.func @transform_0(%arg0: i32) -> (i32, i32) {
    %c0_i32 = arith.constant 0 : i32
    %c0_i32_0 = arith.constant 0 : i32
    return %arg0, %c0_i32 : i32, i32
  }
  func.func @transform_1(%arg0: i32) -> (i32, i32) {
    %c0_i32 = arith.constant 0 : i32
    %c0_i32_0 = arith.constant 0 : i32
    %c0_i32_1 = arith.constant 0 : i32
    return %c0_i32, %c0_i32_0 : i32, i32
  }
  func.func @transform_2(%arg0: i32) -> (i32, i32) {
    %c0_i32 = arith.constant 0 : i32
    %c0_i32_0 = arith.constant 0 : i32
    %c0_i32_1 = arith.constant 0 : i32
    return %c0_i32, %c0_i32_0 : i32, i32
  }
  func.func @transform_3(%arg0: i32) -> (i32, i32) {
    %c0_i32 = arith.constant 0 : i32
    %c0_i32_0 = arith.constant 0 : i32
    %c0_i32_1 = arith.constant 0 : i32
    return %c0_i32, %c0_i32_0 : i32, i32
  }
  func.func @transform_4(%arg0: i32) -> (i32, i32) {
    %c0_i32 = arith.constant 0 : i32
    %c0_i32_0 = arith.constant 0 : i32
    %c0_i32_1 = arith.constant 0 : i32
    return %c0_i32, %c0_i32_0 : i32, i32
  }
  func.func @transform_5(%arg0: i32) -> (i32, i32) {
    %c0_i32 = arith.constant 0 : i32
    %c0_i32_0 = arith.constant 0 : i32
    %c0_i32_1 = arith.constant 0 : i32
    return %c0_i32, %c0_i32_0 : i32, i32
  }
  func.func @transform_6(%arg0: i32) -> (i32, i32) {
    %c0_i32 = arith.constant 0 : i32
    %c0_i32_0 = arith.constant 0 : i32
    %c0_i32_1 = arith.constant 0 : i32
    return %c0_i32, %c0_i32_0 : i32, i32
  }
  func.func @transform_7(%arg0: i32) -> (i32, i32) {
    %c0_i32 = arith.constant 0 : i32
    %c0_i32_0 = arith.constant 0 : i32
    %c0_i32_1 = arith.constant 0 : i32
    return %c0_i32, %c0_i32_0 : i32, i32
  }
  func.func @transform_8(%arg0: i32) -> (i32, i32) {
    %c0_i32 = arith.constant 0 : i32
    %c0_i32_0 = arith.constant 0 : i32
    %c0_i32_1 = arith.constant 0 : i32
    return %c0_i32, %c0_i32_0 : i32, i32
  }
  func.func @transform_9(%arg0: i32) -> (i32, i32) {
    %c0_i32 = arith.constant 0 : i32
    %c0_i32_0 = arith.constant 0 : i32
    %c0_i32_1 = arith.constant 0 : i32
    return %c0_i32, %c0_i32_0 : i32, i32
  }
  func.func @transform_10(%arg0: i32) -> (i32, i32) {
    %c0_i32 = arith.constant 0 : i32
    %c0_i32_0 = arith.constant 0 : i32
    %c0_i32_1 = arith.constant 0 : i32
    return %c0_i32, %c0_i32_0 : i32, i32
  }
  func.func @transform_11(%arg0: i32) -> (i32, i32) {
    %c0_i32 = arith.constant 0 : i32
    %c0_i32_0 = arith.constant 0 : i32
    return %arg0, %c0_i32 : i32, i32
  }
}

</mosaic_0001>

<bundles_post_ra>
// kernel: tpu_custom_call.1
= control target key start
LH: loop header
LB: loop body
LE: loop exit
PB: predicated region body
PF: predicated region fallthrough
CT: control target
= control target key end

     0   :  { %16 = vsyncpa [#allocation4], 0  ;;  %s1775_s0 = inlined_call_operand.hbm [shape: bf16[32,32], index: 0, kind: input, shape index: {}]   ;;  %s1776_s1 = inlined_call_operand.hbm [shape: f32[32,32], index: 1, kind: input, shape index: {}]   ;;  %s1777_s2 = inlined_call_operand.hbm [shape: f32[1,32], index: 2, kind: input, shape index: {}]   ;;  %s1778_s3 = inlined_call_operand.hbm [shape: f32[2,32], index: 3, kind: input, shape index: {}]   ;;  %s1779_s4 = inlined_call_operand.hbm [shape: f32[4,32], index: 4, kind: input, shape index: {}]   ;;  %s1780_s5 = inlined_call_operand.hbm [shape: bf16[32,32], index: 5, kind: input, shape index: {}]   ;;  %s1781_s6 = inlined_call_operand.hbm [shape: f32[1,32], index: 6, kind: input, shape index: {}]   ;;  %s1782_s7 = inlined_call_operand.hbm [shape: bf16[32,64], index: 7, kind: input, shape index: {}]   ;;  %s1783_s8 = inlined_call_operand.hbm [shape: f32[1,64], index: 8, kind: input, shape index: {}]   ;;  %s1784_s9 = inlined_call_operand.hbm [shape: bf16[32,128], index: 9, kind: input, shape index: {}]   ;;  %s1785_s10 = inlined_call_operand.hbm [shape: f32[1,128], index: 10, kind: input, shape index: {}]   ;;  %s1786_s11 = inlined_call_operand.hbm [shape: f32[2,128], index: 11, kind: output, shape index: {}]  }
   0x1   :  { %17 = vsyncpa [#allocation7], 0 }
   0x2   :  { %18 = vsyncpa [#allocation10], 0 }
   0x3   :  { %19 = vsyncpa [#allocation13], 0 }
   0x4   :  { %20 = vsyncpa [#allocation16], 0 }
   0x5   :  { %21 = vsyncpa [#allocation19], 0 }
   0x6   :  { %22 = vsyncpa [#allocation5], 0  ;;  %s1439_s17 = smov [#allocation6]   ;;  %s1161_s21 = scalar_lea.hbm %s1776_s1, 512 }
   0x7   :  { %s40_s18 = sshll.u32 %s1439_s17, 4  ;;  %p1162_p0 = scmp.ne.s32.totalorder %s1776_s1, %s1161_s21  ;;  %s41_s18 = int_to_ptr.vmem [resolvable:$true] %s40_s18 }
   0x8   :  { %p1165_p1 = scmp.lt.u32.totalorder %s1161_s21, %s1776_s1 }
   0xa   :  { %p1167_p2 = pnand %p1165_p1, %p1162_p0 }
   0xc   :  { %1170 = shalt.err (!%p1167_p2)
}
   0xd   :  { %s1171_s26 = scalar_lea.vmem %s41_s18, 512  ;;  %p1176_p4 = scmp.lt.s32.totalorder %s41_s18, %s41_s18 }
   0xe   :  { %p1172_p3 = scmp.ne.s32.totalorder %s41_s18, %s1171_s26  ;;  %p1177_p5 = scmp.lt.s32.totalorder %s1171_s26, %s1171_s26 }
  0x10   :  { %p1178_p6 = por %p1177_p5, %p1176_p4 }
  0x12   :  { %p1179_p7 = pnand %p1178_p6, %p1172_p3 }
  0x14   :  { %1182 = shalt.err (!%p1179_p7)
}
  0x15   :  { %s1440_s27 = smov 128   ;;  %s1441_s28 = smov 8  }
  0x16   :  { %46 = dma.hbm_to_vmem [thread:$0]  %s1776_s1, 512, %s41_s18, [#allocation7], %s1440_s27, %s1440_s27, %s1441_s28  }
  0x17   :  { %s1442_s12 = smov [#allocation9]   ;;  %s1183_s16 = scalar_lea.hbm %s1778_s3, 32 }
  0x18   :  { %s63_s13 = sshll.u32 %s1442_s12, 4  ;;  %p1184_p8 = scmp.ne.s32.totalorder %s1778_s3, %s1183_s16  ;;  %s64_s13 = int_to_ptr.vmem [resolvable:$true] %s63_s13 }
  0x19   :  { %p1187_p9 = scmp.lt.u32.totalorder %s1183_s16, %s1778_s3 }
  0x1b   :  { %p1189_p10 = pnand %p1187_p9, %p1184_p8 }
  0x1d   :  { %1192 = shalt.err (!%p1189_p10)
}
  0x1e   :  { %s1193_s22 = scalar_lea.vmem %s64_s13, 32  ;;  %p1198_p12 = scmp.lt.s32.totalorder %s64_s13, %s64_s13 }
  0x1f   :  { %p1194_p11 = scmp.ne.s32.totalorder %s64_s13, %s1193_s22  ;;  %p1199_p13 = scmp.lt.s32.totalorder %s1193_s22, %s1193_s22 }
  0x21   :  { %p1200_p0 = por %p1199_p13, %p1198_p12 }
  0x23   :  { %p1201_p1 = pnand %p1200_p0, %p1194_p11 }
  0x25   :  { %1204 = shalt.err (!%p1201_p1)
}
  0x26   :  { %66 = dma.hbm_to_vmem [thread:$0]  %s1778_s3, 32, %s64_s13, [#allocation10]  }
  0x27   :  { %s1443_s23 = smov [#allocation12]   ;;  %s1444_s25 = smov [#allocation15]  }
  0x28   :  { %s82_s24 = sshll.u32 %s1443_s23, 4  ;;  %s104_s26 = sshll.u32 %s1444_s25, 4  ;;  %s83_s24 = int_to_ptr.vmem [resolvable:$true] %s82_s24  ;;  %s1543_s26 = int_to_ptr.vmem [resolvable:$true] %s104_s26 }
  0x29   :  { %s1205_s29 = scalar_lea.hbm %s1780_s5, 256 }
  0x2a   :  { %p1206_p2 = scmp.ne.s32.totalorder %s1780_s5, %s1205_s29  ;;  %p1209_p3 = scmp.lt.u32.totalorder %s1205_s29, %s1780_s5 }
  0x2c   :  { %p1211_p4 = pnand %p1209_p3, %p1206_p2 }
  0x2e   :  { %1214 = shalt.err (!%p1211_p4)
}
  0x2f   :  { %s1215_s3 = scalar_lea.vmem %s83_s24, 256  ;;  %p1220_p6 = scmp.lt.s32.totalorder %s83_s24, %s83_s24 }
  0x30   :  { %p1216_p5 = scmp.ne.s32.totalorder %s83_s24, %s1215_s3  ;;  %p1221_p7 = scmp.lt.s32.totalorder %s1215_s3, %s1215_s3 }
  0x32   :  { %p1222_p8 = por %p1221_p7, %p1220_p6 }
  0x34   :  { %p1223_p9 = pnand %p1222_p8, %p1216_p5 }
  0x36   :  { %1226 = shalt.err (!%p1223_p9)
}
  0x37   :  { %s1445_s13 = smov 64   ;;  %s1446_s16 = smov 4  }
  0x38   :  { %88 = dma.hbm_to_vmem [thread:$0]  %s1780_s5, 256, %s83_s24, [#allocation13], %s1445_s13, %s1445_s13, %s1446_s16  }
  0x39   :  { %s1227_s22 = scalar_lea.hbm %s1782_s7, 256 }
  0x3a   :  { %p1228_p10 = scmp.ne.s32.totalorder %s1782_s7, %s1227_s22  ;;  %p1231_p11 = scmp.lt.u32.totalorder %s1227_s22, %s1782_s7 }
  0x3c   :  { %p1233_p12 = pnand %p1231_p11, %p1228_p10 }
  0x3e   :  { %1236 = shalt.err (!%p1233_p12)
}
  0x3f   :  { %s1237_s27 = scalar_lea.vmem %s1543_s26, 256  ;;  %p1242_p0 = scmp.lt.s32.totalorder %s1543_s26, %s1543_s26 }
  0x40   :  { %p1238_p13 = scmp.ne.s32.totalorder %s1543_s26, %s1237_s27  ;;  %p1243_p1 = scmp.lt.s32.totalorder %s1237_s27, %s1237_s27 }
  0x42   :  { %p1244_p2 = por %p1243_p1, %p1242_p0 }
  0x44   :  { %p1245_p3 = pnand %p1244_p2, %p1238_p13 }
  0x46   :  { %1248 = shalt.err (!%p1245_p3)
}
  0x47   :  { %110 = dma.hbm_to_vmem [thread:$0]  %s1782_s7, 256, %s1543_s26, [#allocation16], %s1445_s13, %s1445_s13, %s1446_s16  }
  0x48   :  { %s1447_s28 = smov [#allocation18]   ;;  %s1448_s30 = smov [#allocation3]  }
  0x49   :  { %s126_s29 = sshll.u32 %s1447_s28, 4  ;;  %s28_s12 = sshll.u32 %s1448_s30, 4  ;;  %s127_s29 = int_to_ptr.vmem [resolvable:$true] %s126_s29  ;;  %s1580_s12 = int_to_ptr.vmem [resolvable:$true] %s28_s12 }
  0x4a   :  { %s1249_s3 = scalar_lea.hbm %s1784_s9, 256 }
  0x4b   :  { %p1250_p4 = scmp.ne.s32.totalorder %s1784_s9, %s1249_s3  ;;  %p1253_p5 = scmp.lt.u32.totalorder %s1249_s3, %s1784_s9 }
  0x4d   :  { %p1255_p6 = pnand %p1253_p5, %p1250_p4 }
  0x4f   :  { %1258 = shalt.err (!%p1255_p6)
}
  0x50   :  { %s1259_s7 = scalar_lea.vmem %s127_s29, 256  ;;  %p1264_p8 = scmp.lt.s32.totalorder %s127_s29, %s127_s29 }
  0x51   :  { %p1260_p7 = scmp.ne.s32.totalorder %s127_s29, %s1259_s7  ;;  %p1265_p9 = scmp.lt.s32.totalorder %s1259_s7, %s1259_s7 }
  0x53   :  { %p1266_p10 = por %p1265_p9, %p1264_p8 }
  0x55   :  { %p1267_p11 = pnand %p1266_p10, %p1260_p7 }
  0x57   :  { %1270 = shalt.err (!%p1267_p11)
}
  0x58   :  { %132 = dma.hbm_to_vmem [thread:$0]  %s1784_s9, 256, %s127_s29, [#allocation19], %s1445_s13, %s1445_s13, %s1446_s16  }
  0x59   :  { %s1271_s23 = scalar_lea.hbm %s1775_s0, 256 }
  0x5a   :  { %p1272_p12 = scmp.ne.s32.totalorder %s1775_s0, %s1271_s23  ;;  %p1275_p13 = scmp.lt.u32.totalorder %s1271_s23, %s1775_s0 }
  0x5c   :  { %p1277_p0 = pnand %p1275_p13, %p1272_p12 }
  0x5e   :  { %1280 = shalt.err (!%p1277_p0)
}
  0x5f   :  { %s1281_s28 = scalar_lea.vmem %s1580_s12, 256  ;;  %p1286_p2 = scmp.lt.s32.totalorder %s1580_s12, %s1580_s12 }
  0x60   :  { %p1282_p1 = scmp.ne.s32.totalorder %s1580_s12, %s1281_s28  ;;  %p1287_p3 = scmp.lt.s32.totalorder %s1281_s28, %s1281_s28 }
  0x62   :  { %p1288_p4 = por %p1287_p3, %p1286_p2 }
  0x64   :  { %p1289_p5 = pnand %p1288_p4, %p1282_p1 }
  0x66   :  { %1292 = shalt.err (!%p1289_p5)
}
  0x67   :  { %34 = dma.hbm_to_vmem [thread:$0]  %s1775_s0, 256, %s1580_s12, [#allocation4], %s1445_s13, %s1445_s13, %s1446_s16  }
  0x68   :  { %s1449_s30 = smov [#allocation8]   ;;  %s1450_s15 = smov [#allocation11]  }
  0x69   :  { %s53_s14 = sshll.u32 %s1449_s30, 4  ;;  %s73_s3 = sshll.u32 %s1450_s15, 4  ;;  %s54_s14 = int_to_ptr.vmem [resolvable:$true] %s53_s14  ;;  %s74_s3 = int_to_ptr.vmem [resolvable:$true] %s73_s3 }
  0x6a   :  { %s1293_s20 = scalar_lea.hbm %s1777_s2, 16 }
  0x6b   :  { %p1294_p6 = scmp.ne.s32.totalorder %s1777_s2, %s1293_s20  ;;  %p1297_p7 = scmp.lt.u32.totalorder %s1293_s20, %s1777_s2 }
  0x6d   :  { %p1299_p8 = pnand %p1297_p7, %p1294_p6 }
  0x6f   :  { %1302 = shalt.err (!%p1299_p8)
}
  0x70   :  { %s1303_s0 = scalar_lea.vmem %s54_s14, 16  ;;  %s1307_s13 = scalar_lea.vmem %s54_s14, 32 }
  0x71   :  { %p1304_p9 = scmp.ne.s32.totalorder %s54_s14, %s1303_s0  ;;  %p1308_p10 = scmp.lt.s32.totalorder %s54_s14, %s54_s14 }
  0x72   :  { %p1309_p11 = scmp.lt.s32.totalorder %s1307_s13, %s1303_s0 }
  0x74   :  { %p1310_p12 = por %p1309_p11, %p1308_p10 }
  0x76   :  { %p1311_p13 = pnand %p1310_p12, %p1304_p9 }
  0x78   :  { %1314 = shalt.err (!%p1311_p13)
}
  0x79   :  { %56 = dma.hbm_to_vmem [thread:$0]  %s1777_s2, 16, %s54_s14, [#allocation7]  }
  0x7a   :  { %s1315_s23 = scalar_lea.hbm %s1779_s4, 64 }
  0x7b   :  { %p1316_p0 = scmp.ne.s32.totalorder %s1779_s4, %s1315_s23  ;;  %p1319_p1 = scmp.lt.u32.totalorder %s1315_s23, %s1779_s4 }
  0x7d   :  { %p1321_p2 = pnand %p1319_p1, %p1316_p0 }
  0x7f   :  { %1324 = shalt.err (!%p1321_p2)
}
  0x80   :  { %s1325_s28 = scalar_lea.vmem %s74_s3, 64  ;;  %p1330_p4 = scmp.lt.s32.totalorder %s74_s3, %s74_s3 }
  0x81   :  { %p1326_p3 = scmp.ne.s32.totalorder %s74_s3, %s1325_s28  ;;  %p1331_p5 = scmp.lt.s32.totalorder %s1325_s28, %s1325_s28 }
  0x83   :  { %p1332_p6 = por %p1331_p5, %p1330_p4 }
  0x85   :  { %p1333_p7 = pnand %p1332_p6, %p1326_p3 }
  0x87   :  { %1336 = shalt.err (!%p1333_p7)
}
  0x88   :  { %76 = dma.hbm_to_vmem [thread:$0]  %s1779_s4, 64, %s74_s3, [#allocation10]  }
  0x89   :  { %s1451_s29 = smov [#allocation14]   ;;  %s1452_s14 = smov [#allocation17]  }
  0x8a   :  { %s95_s30 = sshll.u32 %s1451_s29, 4  ;;  %s117_s15 = sshll.u32 %s1452_s14, 4  ;;  %s96_s30 = int_to_ptr.vmem [resolvable:$true] %s95_s30  ;;  %s118_s15 = int_to_ptr.vmem [resolvable:$true] %s117_s15 }
  0x8b   :  { %s1337_s20 = scalar_lea.hbm %s1781_s6, 16 }
  0x8c   :  { %p1338_p8 = scmp.ne.s32.totalorder %s1781_s6, %s1337_s20  ;;  %p1341_p9 = scmp.lt.u32.totalorder %s1337_s20, %s1781_s6 }
  0x8e   :  { %p1343_p10 = pnand %p1341_p9, %p1338_p8 }
  0x90   :  { %1346 = shalt.err (!%p1343_p10)
}
  0x91   :  { %s1347_s4 = scalar_lea.vmem %s96_s30, 16  ;;  %s1351_s3 = scalar_lea.vmem %s96_s30, 32 }
  0x92   :  { %p1348_p11 = scmp.ne.s32.totalorder %s96_s30, %s1347_s4  ;;  %p1352_p12 = scmp.lt.s32.totalorder %s96_s30, %s96_s30 }
  0x93   :  { %p1353_p13 = scmp.lt.s32.totalorder %s1351_s3, %s1347_s4 }
  0x95   :  { %p1354_p0 = por %p1353_p13, %p1352_p12 }
  0x97   :  { %p1355_p1 = pnand %p1354_p0, %p1348_p11 }
  0x99   :  { %1358 = shalt.err (!%p1355_p1)
}
  0x9a   :  { %98 = dma.hbm_to_vmem [thread:$0]  %s1781_s6, 16, %s96_s30, [#allocation13]  }
  0x9b   :  { %s1359_s1 = scalar_lea.hbm %s1783_s8, 16 }
  0x9c   :  { %p1360_p2 = scmp.ne.s32.totalorder %s1783_s8, %s1359_s1  ;;  %p1363_p3 = scmp.lt.u32.totalorder %s1359_s1, %s1783_s8 }
  0x9e   :  { %p1365_p4 = pnand %p1363_p3, %p1360_p2 }
  0xa0   :  { %1368 = shalt.err (!%p1365_p4)
}
  0xa1   :  { %s1369_s5 = scalar_lea.vmem %s118_s15, 16  ;;  %s1373_s24 = scalar_lea.vmem %s118_s15, 32 }
  0xa2   :  { %p1370_p5 = scmp.ne.s32.totalorder %s118_s15, %s1369_s5  ;;  %p1374_p6 = scmp.lt.s32.totalorder %s118_s15, %s118_s15 }
  0xa3   :  { %p1375_p7 = scmp.lt.s32.totalorder %s1373_s24, %s1369_s5 }
  0xa5   :  { %p1376_p8 = por %p1375_p7, %p1374_p6 }
  0xa7   :  { %p1377_p9 = pnand %p1376_p8, %p1370_p5 }
  0xa9   :  { %1380 = shalt.err (!%p1377_p9)
}
  0xaa   :  { %120 = dma.hbm_to_vmem [thread:$0]  %s1783_s8, 16, %s118_s15, [#allocation16]  }
  0xab   :  { %s1453_s2 = smov [#allocation20]   ;;  %s1381_s14 = scalar_lea.hbm %s1785_s10, 16 }
  0xac   :  { %s139_s9 = sshll.u32 %s1453_s2, 4  ;;  %p1382_p10 = scmp.ne.s32.totalorder %s1785_s10, %s1381_s14  ;;  %s140_s9 = int_to_ptr.vmem [resolvable:$true] %s139_s9 }
  0xad   :  { %p1385_p11 = scmp.lt.u32.totalorder %s1381_s14, %s1785_s10 }
  0xaf   :  { %p1387_p12 = pnand %p1385_p11, %p1382_p10 }
  0xb1   :  { %1390 = shalt.err (!%p1387_p12)
}
  0xb2   :  { %s1391_s7 = scalar_lea.vmem %s140_s9, 16  ;;  %s1395_s8 = scalar_lea.vmem %s140_s9, 32 }
  0xb3   :  { %p1392_p13 = scmp.ne.s32.totalorder %s140_s9, %s1391_s7  ;;  %p1396_p0 = scmp.lt.s32.totalorder %s140_s9, %s140_s9 }
  0xb4   :  { %p1397_p1 = scmp.lt.s32.totalorder %s1395_s8, %s1391_s7 }
  0xb6   :  { %p1398_p2 = por %p1397_p1, %p1396_p0 }
  0xb8   :  { %p1399_p3 = pnand %p1398_p2, %p1392_p13 }
  0xba   :  { %1402 = shalt.err (!%p1399_p3)
}
  0xbb   :  { %142 = dma.hbm_to_vmem [thread:$0]  %s1785_s10, 16, %s140_s9, [#allocation19]  }
  0xbc   :  { %1425 = dma.done.wait [#allocation4], 256  }
  0xbd   :  { %1426 = vsyncadd [#allocation4], 4294967040 }
  0xbe   :  { %1427 = dma.done.wait [#allocation7], 528  }
  0xbf   :  { %1428 = vsyncadd [#allocation7], 4294966768 }
  0xc0   :  { %1429 = dma.done.wait [#allocation10], 96  }
  0xc1   :  { %1430 = vsyncadd [#allocation10], 4294967200 }
  0xc2   :  { %1431 = dma.done.wait [#allocation13], 272  }
  0xc3   :  { %1432 = vsyncadd [#allocation13], 4294967024 }
  0xc4   :  { %1433 = dma.done.wait [#allocation16], 272  }
  0xc5   :  { %1434 = vsyncadd [#allocation16], 4294967024 }
  0xc6   :  { %1435 = dma.done.wait [#allocation19], 272  }
  0xc7   :  { %1436 = vsyncadd [#allocation19], 4294967024  ;;  %v1454_v0 = vmov 0.0|0.0   ;;  %vm1455_vm0 = vmmov 0   ;;  %v1456_v1 = vmov 0.0   ;;  %v984_v2 = vld [vmem:[#allocation3] sm:$0xff]   ;;  %v464_v42 = vlaneseq }
  0xc8   :  { %1093 = vmatprep.subr.bf16.mxu0 %v1454_v0  ;;  %1030 = vmatprep.mubr.msk.f32.mxu0 %vm1455_vm0, %v1456_v1  ;;  %v185_v3 = vld [vmem:[#allocation6] sm:$0xff]  ;;  %v186_v4 = vld [vmem:[#allocation6 + $0x8] sm:$0xff]  ;;  %v985_v5 = vunpack.c.l.bf16 %v984_v2  ;;  %v986_v6 = vunpack.c.h.bf16 %v984_v2  ;;  %v991_v7 = vld [vmem:[#allocation3 + $0x8] sm:$0xff]   ;;  %vm203_vm1 = vcmask 261120   ;;  %s1457_s10 = smov 96   ;;  %vm553_vm3 = vcmask 257024  }
  0xc9   :  { %1033 = vmatprep.subr.bf16.mxu1 %v1456_v1  ;;  %1037 = vmatprep.mubr.msk.bf16.mxu1 %vm1455_vm0, %v1456_v1  ;;  %v187_v10 = vld [vmem:[#allocation6 + $0x10] sm:$0xff]  ;;  %v188_v11 = vld [vmem:[#allocation6 + $0x18] sm:$0xff]  ;;  %v989_v13 = vunpack.c.l.bf16 %v991_v7  ;;  %v990_v14 = vunpack.c.h.bf16 %v991_v7  ;;  %v195_v15 = vld [vmem:[#allocation9] sm:$0x3]  ;;  %v465_v43 = vshrl.u32 %v464_v42, 7  ;;  %vm557_vm4 = vcmask 125952  }
  0xca   :  { %1095 = vmatpush3.bf16.msra.mxu0 %v984_v2  ;;  %v189_v8 = vadd.f32 %v985_v5, %v185_v3  ;;  %v190_v9 = vadd.f32 %v986_v6, %v186_v4  ;;  %v1143_v12 = vld [vmem:[#allocation15] sm:$0xff]   ;;  %v1144_v16 = vld [vmem:[#allocation15 + $0x8] sm:$0xff]   ;;  %v1146_v22 = vld [vmem:[#allocation12 + $0x8] sm:$0xff]   ;;  %vm584_vm5 = vcmask 130048   ;;  %vm667_vm6 = vcmask 253952   ;;  %s1458_s22 = smov [#allocation21]  }
  0xcb   :  { %1096 = vmatprep.subr.bf16.mxu0 %v1454_v0  ;;  %v1145_v18 = vld [vmem:[#allocation12] sm:$0xff]   ;;  %v191_v19 = vadd.f32 %v989_v13, %v187_v10  ;;  %v192_v20 = vadd.f32 %v990_v14, %v188_v11  ;;  %v959_v23 = vld [vmem:[#allocation8] ss:$0 sm:$0xff]  ;;  %vm1708_vm2 = vmpackc.low %vm203_vm1, %vm203_vm1  ;;  %v466_v48 = vsub.s32 0, %v465_v43  ;;  %v671_v54 = vsub.s32 1, %v465_v43  ;;  %s945_s4 = sshll.u32 %s1458_s22, 4  ;;  %s946_s4 = int_to_ptr.vmem [resolvable:$true] %s945_s4 }
  0xcc   :  { %v193_v17 = vpack.c.bf16 %v190_v9, %v189_v8  ;;  %1034 = vmatpush3.bf16.msra.mxu1 %v1145_v18  ;;  %v965_v28 = vld [vmem:[#allocation17] ss:$0 sm:$0xff]  ;;  %v961_v44 = vld [vmem:[#allocation14] ss:$0 sm:$0xff]  ;;  %v1718_v56 = vld [vmem:[#allocation11] sm:$0xf]  ;;  %p1408_p5 = scmp.lt.s32.totalorder %s946_s4, %s946_s4 }
  0xcd   :  { %1035 = vmatprep.subr.bf16.mxu1 %v1456_v1  ;;  %v194_v21 = vpack.c.bf16 %v192_v20, %v191_v19  ;;  %s1403_s3 = scalar_lea.vmem %s946_s4, 32 }
  0xce   :  { %1098 = vmatpush3.bf16.msra.mxu0 %v991_v7  ;;  %p1404_p4 = scmp.ne.s32.totalorder %s946_s4, %s1403_s3  ;;  %p1409_p6 = scmp.lt.s32.totalorder %s1403_s3, %s1403_s3 }
  0xcf   :  { %1041 = vmatprep.subr.bf16.mxu0 %v1143_v12 }
  0xd0   :  { %1036 = vmatpush3.bf16.msra.mxu1 %v1146_v22  ;;  %p1410_p7 = por %p1409_p6, %p1408_p5 }
  0xd1   :  { %1031 = vmatmul.mubr.msk.f32.vlgmr.msra.gmra.mrb[0].mxu0 %vm203_vm1, %v195_v15  ;;  %1049 = vmatprep.subr.bf16.mxu1 %v1456_v1 }
  0xd2   :  { %1042 = vmatpush3.bf16.msra.mxu0 %v1143_v12  ;;  %1045 = vmatprep.mubr.msk.bf16.mxu0 %vm203_vm1, %v193_v17  ;;  %p1411_p8 = pnand %p1410_p7, %p1404_p4 }
  0xd3   :  { %1043 = vmatprep.subr.bf16.mxu0 %v1144_v16 }
  0xd6   :  { %1044 = vmatpush3.bf16.msra.mxu0 %v1144_v16 }
  0xd7   :  { %1099 = vmatprep.subr.bf16.mxu0 %v1454_v0 }
  0xd9   :  { %1046 = vmatmul.mubr.msk.bf16.vlgmr.msra.gmra.mrb[4].mxu0 %vm203_vm1, %v194_v21 }
  0xda   :  { %1061 = vmatprep.mubr.msk.f32.mxu0 %vm1455_vm0, %v1456_v1 }
 0x1a4   :  { %v273_v24 = vpop.f32.mrb[0].mxu0 }
 0x1a5   :  { %v274_v25 = vadd.f32 %v959_v23, %v273_v24  ;;  %v1032_v26 = vpop.f32.mrb[1].mxu0 }
 0x1a7   :  { %v277_v27 = vpack.c.bf16 %v274_v25, %v274_v25 }
 0x1a9   :  { %1038 = vmatmul.mubr.msk.bf16.vlgmr.msra.gmra.mrb[0].mxu1 %vm203_vm1, %v277_v27 }
 0x1aa   :  { %1050 = vmatpush3.bf16.msra.mxu1 %v1143_v12  ;;  %1053 = vmatprep.mubr.msk.bf16.mxu1 %vm1455_vm0, %v1456_v1 }
 0x1ab   :  { %1051 = vmatprep.subr.bf16.mxu1 %v1456_v1 }
 0x1ac   :  { %v1047_v29 = vpop.f32.mrb[4].mxu0 }
 0x1ad   :  { %v1696_v30 = vadd.f32 %v1047_v29, %v965_v28  ;;  %v408_v31 = vpop.f32.mrb[5].mxu0 }
 0x1ae   :  { %1052 = vmatpush3.bf16.msra.mxu1 %v1144_v16  ;;  %v409_v32 = vadd.f32 %v965_v28, %v408_v31  ;;  %v1048_v33 = vpop.f32.mrb[6].mxu0 }
 0x1af   :  { %v1698_v34 = vadd.f32 %v1048_v33, %v965_v28  ;;  %v411_v35 = vpop.f32.mrb[7].mxu0  ;;  %1110 = vmatprep.subr.bf16.mxu1 %v1454_v0 }
 0x1b0   :  { %v412_v36 = vadd.f32 %v965_v28, %v411_v35 }
 0x1b1   :  { %1054 = vmatmul.mubr.msk.bf16.vlgmr.msra.gmra.mrb[4].mxu1 %vm203_vm1, %v277_v27  ;;  %v1138_v37 = vpack.i.bf16 %v1698_v34, %v1696_v30  ;;  %v1107_v38 = vpack.c.bf16 %v1698_v34, %v1696_v30 }
 0x1b2   :  { %v1100_v40 = vpack.c.bf16 %v412_v36, %v409_v32  ;;  %v1133_v41 = vpack.i.bf16 %v412_v36, %v409_v32  ;;  %1082 = vmatprep.mubr.msk.f32.mxu1 %vm1455_vm0, %v1456_v1 }
 0x1b4   :  { %1134 = vrot.lane.b32.xlu1 %v1133_v41, %s1457_s10  ;;  %1102 = vmatpush3.bf16.xpose.msk.msra.mxu0 %vm1708_vm2, %v1100_v40 }
 0x1b5   :  { %1103 = vmatprep.subr.bf16.mxu0 %v1454_v0 }
 0x226   :  { %v1135_v45 = vpop.permute.xlu1 %1134 }
 0x227   :  { %v1137_v51 = vunpack.i.h.bf16 %v1135_v45  ;;  %v1136_v52 = vunpack.i.l.bf16 %v1135_v45 }
 0x229   :  { %v1104_v58 = vpack.c.bf16 %v1137_v51, %v1136_v52 }
 0x27c   :  { %v338_v46 = vpop.f32.mrb[0].mxu1 }
 0x27d   :  { %v339_v47 = vadd.f32 %v961_v44, %v338_v46  ;;  %v1039_v49 = vpop.f32.mrb[1].mxu1 }
 0x27e   :  { %v341_v50 = vpop.f32.mrb[2].mxu1 }
 0x27f   :  { %v344_v53 = vmul.f32 0.35355338, %v339_v47  ;;  %v1040_v55 = vpop.f32.mrb[3].mxu1 }
 0x281   :  { %v467_v57 = vrot.slane %v344_v53, %v466_v48  ;;  %v672_v60 = vrot.slane %v344_v53, %v671_v54 }
 0x283   :  { %v468_v59 = vmul.f32 %v467_v57, %v1718_v56  ;;  %v673_v6 = vmul.f32 %v672_v60, %v1718_v56  ;;  %v1148_v60 = vld [vmem:[#allocation18 + $0x8] sm:$0xff]  }
 0x284   :  { %v457_v61 = vpop.f32.mrb[4].mxu1 }
 0x285   :  { %v458_v62 = vadd.f32 %v965_v28, %v457_v61  ;;  %v1055_v63 = vpop.f32.mrb[5].mxu1  ;;  %1062 = vmatmul.mubr.msk.f32.vlgmr.msra.gmra.mrb[2].mxu0 %vm203_vm1, %v468_v59 }
 0x286   :  { %v460_v2 = vpop.f32.mrb[6].mxu1  ;;  %1105 = vmatpush3.bf16.msra.mxu0 %v1104_v58  ;;  %1068 = vmatprep.mubr.msk.f32.mxu0 %vm1455_vm0, %v1456_v1 }
 0x287   :  { %v551_v3 = vrot.slane %v458_v62, %v466_v48  ;;  %v1724_v4 = vrot.slane %v458_v62, %v671_v54  ;;  %v1056_v5 = vpop.f32.mrb[7].mxu1  ;;  %1106 = vmatprep.subr.bf16.mxu0 %v1454_v0 }
 0x289   :  { %v552_v7 = vmul.f32 %v551_v3, %v468_v59  ;;  %v757_v8 = vmul.f32 %v1724_v4, %v673_v6  ;;  %v1147_v59 = vld [vmem:[#allocation18] sm:$0xff]  }
 0x28b   :  { %v554_v9 = vsel %vm553_vm3, %v552_v7, 0.0  ;;  %v758_v10 = vsel %vm553_vm3, %v757_v8, 0.0 }
 0x28c   :  { %555 = vadd.xlane.f32.xlu0 %v554_v9  ;;  %759 = vadd.xlane.f32.xlu1 %v758_v10 }
 0x319   :  { %v556_v14 = vpop.xlane.xlu0 %555  ;;  %v760_v29 = vpop.xlane.xlu1 %759 }
 0x358   :  { %v544_v11 = vpop.f32.mrb[2].mxu0 }
 0x359   :  { %v1063_v12 = vpop.f32.mrb[3].mxu0  ;;  %v558_v13 = vsel %vm557_vm4, %v544_v11, -inf }
 0x35a   :  { %559 = vmax.xlane.f32.xlu0 %v558_v13 }
 0x3e7   :  { %v560_v15 = vpop.xlane.xlu0 %559 }
 0x3e8   :  { %v561_v16 = vmax.f32 %v560_v15, %v556_v14 }
 0x3ea   :  { %v562_v0 = vsub.f32 %v544_v11, %v561_v16  ;;  %v565_v17 = vsub.f32 %v556_v14, %v561_v16  ;;  %v979_v16 = vld [vmem:[#allocation20] ss:$0 sm:$0xff] }
 0x3ec   :  { %v563_v18 = vmul.f32 1.442695, %v562_v0  ;;  %v566_v19 = vmul.f32 1.442695, %v565_v17 }
 0x3ee   :  { %1149 = vpow2.f32 %v563_v18 }
 0x3ef   :  { %1151 = vpow2.f32 %v566_v19 }
 0x3f8   :  { %v1150_v20 = vpop.eup %1149 }
 0x3f9   :  { %v1152_v21 = vpop.eup %1151  ;;  %1069 = vmatmul.mubr.msk.f32.vlgmr.msra.gmra.mrb[8].mxu0 %vm584_vm5, %v1150_v20  ;;  %v568_v28 = vsel %vm557_vm4, %v1150_v20, 0.0 }
 0x3fa   :  { %1109 = vmatpush3.bf16.xpose.msk.msra.mxu0 %vm1708_vm2, %v1107_v38  ;;  %v573_v22 = vmul.f32 %v1152_v21, %v551_v3  ;;  %1075 = vmatprep.mubr.msk.f32.mxu0 %vm1455_vm0, %v1456_v1 }
 0x3fc   :  { %581 = vrot.lane.b32.xlu1 %v573_v22, %s1457_s10 }
 0x401   :  { %1076 = vmatmul.mubr.msk.f32.vlgmr.msra.gmra.mrb[10].mxu0 %vm203_vm1, %v673_v6 }
 0x46e   :  { %v582_v46 = vpop.permute.xlu1 %581 }
 0x4cc   :  { %v654_v23 = vpop.f32.mrb[8].mxu0 }
 0x4cd   :  { %v1070_v24 = vpop.f32.mrb[9].mxu0  ;;  %v655_v47 = vadd.f32 %v654_v23, %v582_v46 }
 0x4d4   :  { %v749_v25 = vpop.f32.mrb[10].mxu0 }
 0x4d5   :  { %v1077_v26 = vpop.f32.mrb[11].mxu0  ;;  %v761_v27 = vsel %vm557_vm4, %v749_v25, -inf }
 0x4d6   :  { %762 = vmax.xlane.f32.xlu0 %v761_v27 }
 0x4ec   :  { %1139 = vrot.lane.b32.xlu0 %v1138_v37, %s1457_s10 }
 0x50b   :  { %569 = vadd.xlane.f32.xlu0 %v568_v28 }
 0x563   :  { %v763_v31 = vpop.xlane.xlu0 %762 }
 0x564   :  { %v764_v32 = vmax.f32 %v763_v31, %v760_v29 }
 0x566   :  { %v765_v33 = vsub.f32 %v749_v25, %v764_v32  ;;  %v768_v41 = vsub.f32 %v760_v29, %v764_v32 }
 0x567   :  { %v1140_v35 = vpop.permute.xlu0 %1139 }
 0x568   :  { %v766_v36 = vmul.f32 1.442695, %v765_v33  ;;  %v1142_v38 = vunpack.i.h.bf16 %v1140_v35  ;;  %v1141_v39 = vunpack.i.l.bf16 %v1140_v35  ;;  %v769_v30 = vmul.f32 1.442695, %v768_v41 }
 0x56a   :  { %1153 = vpow2.f32 %v766_v36  ;;  %v1111_v40 = vpack.c.bf16 %v1142_v38, %v1141_v39 }
 0x56b   :  { %1155 = vpow2.f32 %v769_v30 }
 0x56c   :  { %1112 = vmatpush3.bf16.msra.mxu1 %v1111_v40 }
 0x56d   :  { %1085 = vmatprep.subr.bf16.mxu1 %v1456_v1 }
 0x574   :  { %v1154_v42 = vpop.eup %1153 }
 0x575   :  { %1083 = vmatmul.mubr.msk.f32.vlgmr.msra.gmra.mrb[8].mxu1 %vm584_vm5, %v1154_v42  ;;  %v771_v34 = vsel %vm557_vm4, %v1154_v42, 0.0  ;;  %v1156_v37 = vpop.eup %1155 }
 0x576   :  { %772 = vadd.xlane.f32.xlu1 %v771_v34  ;;  %1089 = vmatprep.mubr.msk.bf16.mxu1 %vm1455_vm0, %v1456_v1  ;;  %v776_v43 = vmul.f32 %v1156_v37, %v1724_v4 }
 0x577   :  { %1086 = vmatpush3.bf16.msra.mxu1 %v1147_v59 }
 0x578   :  { %1087 = vmatprep.subr.bf16.mxu1 %v1456_v1 }
 0x57b   :  { %1088 = vmatpush3.bf16.msra.mxu1 %v1148_v60 }
 0x587   :  { %784 = vrot.lane.b32.xlu1 %v776_v43, %s1457_s10 }
 0x598   :  { %v570_v44 = vpop.xlane.xlu0 %569 }
 0x599   :  { %v571_v45 = vadd.f32 %v1152_v21, %v570_v44 }
 0x59b   :  { %1157 = vrcp.f32 %v571_v45 }
 0x5a5   :  { %v1158_v48 = vpop.eup %1157 }
 0x5a6   :  { %v658_v49 = vmul.f32 %v1158_v48, %v655_v47 }
 0x5a8   :  { %v659_v50 = vmul.f32 %v658_v49, %v1718_v56 }
 0x5aa   :  { %v660_v51 = vsel %vm553_vm3, %v659_v50, 0.0 }
 0x5ab   :  { %v661_v52 = vrot.slane %v660_v51, 4 }
 0x5ad   :  { %v662_v53 = vadd.f32 %v661_v52, %v660_v51 }
 0x5af   :  { %v663_v54 = vrot.slane %v662_v53, 2 }
 0x5b1   :  { %v664_v55 = vadd.f32 %v663_v54, %v662_v53 }
 0x5b3   :  { %v665_v57 = vrot.slane %v664_v55, 1 }
 0x5b5   :  { %v666_v58 = vadd.f32 %v665_v57, %v664_v55 }
 0x5b7   :  { %668 = vst.msk [vmem:[#allocation2] sm:$0x1] %vm667_vm6, %v666_v58 }
 0x603   :  { %v773_v61 = vpop.xlane.xlu1 %772 }
 0x604   :  { %v774_v62 = vadd.f32 %v1156_v37, %v773_v61 }
 0x606   :  { %1159 = vrcp.f32 %v774_v62 }
 0x607   :  { %v785_v63 = vpop.permute.xlu1 %784 }
 0x610   :  { %v1160_v5 = vpop.eup %1159 }
 0x648   :  { %v856_v2 = vpop.f32.mrb[8].mxu1 }
 0x649   :  { %v857_v3 = vadd.f32 %v856_v2, %v785_v63  ;;  %v1084_v4 = vpop.f32.mrb[9].mxu1 }
 0x64b   :  { %v860_v6 = vmul.f32 %v1160_v5, %v857_v3 }
 0x64d   :  { %v861_v7 = vmul.f32 %v860_v6, %v1718_v56 }
 0x64f   :  { %v862_v8 = vsel %vm553_vm3, %v861_v7, 0.0 }
 0x650   :  { %v863_v9 = vrot.slane %v862_v8, 4 }
 0x652   :  { %v864_v10 = vadd.f32 %v863_v9, %v862_v8 }
 0x654   :  { %v865_v11 = vrot.slane %v864_v10, 2 }
 0x656   :  { %v866_v12 = vadd.f32 %v865_v11, %v864_v10 }
 0x658   :  { %v867_v13 = vrot.slane %v866_v12, 1 }
 0x65a   :  { %v868_v1 = vadd.f32 %v867_v13, %v866_v12 }
 0x65c   :  { %869 = vst.msk [vmem:[#allocation2 + $0x1] sm:$0x1] %vm667_vm6, %v868_v1 }
 0x663   :  { %v870_v14 = vld [vmem:[#allocation2] sm:$0x3] }
 0x664   :  { %v871_v15 = vpack.c.bf16 %v870_v14, %v870_v14 }
 0x666   :  { %1090 = vmatmul.mubr.msk.bf16.vlgmr.msra.gmra.mrb[12].mxu1 %vm203_vm1, %v871_v15 }
 0x739   :  { %v932_v0 = vpop.f32.mrb[12].mxu1 }
 0x73a   :  { %v933_v17 = vadd.f32 %v979_v16, %v932_v0  ;;  %v1091_v56 = vpop.f32.mrb[13].mxu1 }
 0x73b   :  { %v935_v18 = vpop.f32.mrb[14].mxu1 }
 0x73c   :  { %938 = vst [vmem:[#allocation21] sm:$0x3] %v933_v17  ;;  %v1092_v19 = vpop.f32.mrb[15].mxu1 }
 0x73d   :  { %1414 = shalt.err (!%p1411_p8)
}
 0x73e   :  { %s1415_s16 = scalar_lea.hbm %s1786_s11, 32 }
 0x73f   :  { %p1416_p9 = scmp.ne.s32.totalorder %s1786_s11, %s1415_s16  ;;  %p1419_p10 = scmp.lt.u32.totalorder %s1415_s16, %s1786_s11 }
 0x741   :  { %p1421_p11 = pnand %p1419_p10, %p1416_p9 }
 0x743   :  { %1424 = shalt.err (!%p1421_p11)
}
 0x744   :  { %948 = dma.vmem_to_hbm [thread:$0]  %s946_s4, 32, %s1786_s11, [#allocation5]  }
 0x745   :  { %1437 = dma.done.wait [#allocation5], 32  }
 0x746   :  { %1438 = vsyncadd [#allocation5], 4294967264 }
 0x747   :  { %952 = vsyncpa [#allocation4], 1 }
 0x748   :  { %953 = vsyncpa [#allocation7], 1 }
 0x749   :  { %954 = vsyncpa [#allocation10], 1 }
 0x74a   :  { %955 = vsyncpa [#allocation13], 1 }
 0x74b   :  { %956 = vsyncpa [#allocation16], 1 }
 0x74c   :  { %957 = vsyncpa [#allocation19], 1 }
 0x74d   :  { %958 = vsyncpa [#allocation5], 1 }

</bundles_post_ra>
